<compile_context>
chip_gen: v5e
topology: v5e:2x2
jax: 0.10.0
libtpu: 0.0.40
codegen_flags: <defaults>
</compile_context>

<pallas_src>
import functools

import jax
import jax.numpy as jnp
from jax import lax
from jax.experimental import pallas as pl
from jax.experimental.pallas import tpu as pltpu

TEMPERATURE = 0.1

# Masked-lane fill value: exp((fill - row_max) * inv_t) is exactly 0.  It stays
# finite for any sane temperature; only inv_t > ~3e8 would push the product to
# -inf, which is still harmless because exp(-inf) == 0.
_NEG_FILL = -1e30

_LANE = 128
_SUBLANE = 8
_MAX_TILE_ELEMS = 1 << 20          # ~4 MiB f32 neg tile (85-90% of HBM roofline)
_MAX_TILE_ROWS = 2048
_VMEM_LIMIT_BYTES = 32 * 1024 * 1024


def _round_up(x, m):
    return ((x + m - 1) // m) * m


def _contrastive_loss_kernel(pos_ref, neg_ref, out_ref, m_scr, s_scr, *,
                             inv_t, k_total, n_rows):
    """Grid = (row_tiles, k_tiles); K axis is an online-logsumexp reduction.

    pos_ref: (tn, 1) VMEM    neg_ref: (tn, tk) VMEM    out_ref: (1, 1) SMEM
    m_scr/s_scr: (tn, 1) f32 VMEM scratch (running raw max / running exp-sum).
    """
    i = pl.program_id(0)
    k = pl.program_id(1)
    nk = pl.num_programs(1)
    tn, tk = neg_ref.shape

    @pl.when(k == 0)
    def _init():
        m_scr[...] = jnp.full(m_scr.shape, -jnp.inf, dtype=jnp.float32)
        s_scr[...] = jnp.zeros(s_scr.shape, dtype=jnp.float32)

    # Load this K slab and mask lanes past the true K (ragged last slab and/or
    # K not a multiple of 128).  Upcast to f32 in-register (bf16 inputs OK).
    col = lax.broadcasted_iota(jnp.int32, (tn, tk), 1) + k * tk
    neg = jnp.where(col < k_total, neg_ref[...].astype(jnp.float32), _NEG_FILL)

    # Online logsumexp update.  Running max is kept in RAW (unscaled) units and
    # inv_t is folded into the exp() arguments -> no scaled tile copy is live.
    m_old = m_scr[...]
    m_new = jnp.maximum(m_old, jnp.max(neg, axis=-1, keepdims=True))
    alpha = jnp.exp((m_old - m_new) * inv_t)
    s_scr[...] = alpha * s_scr[...] + jnp.sum(
        jnp.exp((neg - m_new) * inv_t), axis=-1, keepdims=True)
    m_scr[...] = m_new

    @pl.when(k == nk - 1)
    def _finalize():
        # TODO(synk): if the single EUP becomes binding on v7x (3.2 TB/s HBM),
        # compute the bulk exp above in bf16 (f32 accumulate) on v6e/v7x.
        p = pos_ref[...].astype(jnp.float32) * (2.0 * inv_t)    # logits[:,0]
        mn = m_scr[...] * inv_t                                  # scaled neg max
        big = jnp.maximum(p, mn)
        sum_exp = jnp.exp(p - big) + s_scr[...] * jnp.exp(mn - big)
        loss = big + jnp.log(sum_exp) - p                        # (tn, 1)
        # Mask rows past the true N (partial last row tile) before the sum so
        # garbage rows never contaminate the mean.
        row = lax.broadcasted_iota(jnp.int32, (tn, 1), 0) + i * tn
        loss = jnp.where(row < n_rows, loss, 0.0)
        out_ref[0, 0] = jnp.sum(loss)


def contrastive_weight_head_loss(pos, neg, temperature=TEMPERATURE, *,
                                 max_tile_elems=_MAX_TILE_ELEMS):
    """pos: (N, 1), neg: (N, K) (f32 or bf16) -> scalar f32 mean CE loss."""
    n_rows, one = pos.shape
    assert one == 1, "pos must be (N, 1)"
    n_rows_neg, k_total = neg.shape
    assert n_rows_neg == n_rows

    # ---------------- tiling ----------------
    k_lanes = _round_up(k_total, _LANE)          # lane footprint of a full-K row
    n_pad8 = _round_up(n_rows, _SUBLANE)
    # Keep >= 2 row tiles whenever N allows it (v7x has 2 TensorCores).
    tn_two_tiles = max(_SUBLANE, _round_up(pl.cdiv(n_rows, 2), _SUBLANE))

    tn_full_k = (max_tile_elems // k_lanes) // _SUBLANE * _SUBLANE
    if tn_full_k >= _SUBLANE:
        # Common case: one K slab spans the whole row (no 128-divisibility
        # needed since the block equals the full K dim -> no padding pass).
        tk = k_total
        num_k = 1
        tn = max(_SUBLANE,
                 min(_MAX_TILE_ROWS, tn_two_tiles, n_pad8, tn_full_k))
    else:
        # Very wide K fallback: tile K (multiples of 128) + online logsumexp.
        tn = _SUBLANE
        tk = min(k_lanes, (max_tile_elems // _SUBLANE) // _LANE * _LANE)
        num_k = pl.cdiv(k_total, tk)

    num_row_tiles = pl.cdiv(n_rows, tn)
    grid = (num_row_tiles, num_k)

    partial = pl.pallas_call(
        functools.partial(_contrastive_loss_kernel,
                          inv_t=float(1.0 / temperature),
                          k_total=k_total, n_rows=n_rows),
        out_shape=jax.ShapeDtypeStruct((num_row_tiles, 1), jnp.float32),
        grid=grid,
        in_specs=[
            # TODO(synk): best is to fuse with the producer of pos/neg and take
            # pos as column 0 of the neg tile (lane-dense, no separate DMA).
            pl.BlockSpec((tn, 1), lambda i, k: (i, 0)),
            pl.BlockSpec((tn, tk), lambda i, k: (i, k)),
        ],
        out_specs=pl.BlockSpec((1, 1), lambda i, k: (i, 0),
                               memory_space=pltpu.MemorySpace.SMEM),
        scratch_shapes=[
            pltpu.VMEM((tn, 1), jnp.float32),    # running raw max
            pltpu.VMEM((tn, 1), jnp.float32),    # running sum of exp
        ],
        compiler_params=pltpu.CompilerParams(
            dimension_semantics=("parallel", "arbitrary"),
            vmem_limit_bytes=_VMEM_LIMIT_BYTES),
    )(pos, neg)

    # Final mean over the num_row_tiles partial sums; 1/N folded as a literal.
    return jnp.sum(partial) * (1.0 / n_rows)


def _reference_loss(pos, neg, temperature=TEMPERATURE):
    logits = jnp.concatenate([pos, neg], axis=1).astype(jnp.float32) / temperature
    logits = logits.at[:, 0].multiply(2.0)
    lse = jax.scipy.special.logsumexp(logits, axis=1)
    return jnp.mean(lse - logits[:, 0])


if __name__ == "__main__":
    key = jax.random.PRNGKey(0)

    # Case 1: small shapes consistent with the head (N positives, NxK negatives).
    N, K = 8, 32
    k_pos, k_neg, k_pos2, k_neg2 = jax.random.split(key, 4)
    pos = jax.random.normal(k_pos, (N, 1), dtype=jnp.float32)
    neg = jax.random.normal(k_neg, (N, K), dtype=jnp.float32)
    loss = jax.block_until_ready(contrastive_weight_head_loss(pos, neg))
    ref = jax.block_until_ready(_reference_loss(pos, neg))
    assert jnp.allclose(loss, ref, rtol=1e-5, atol=1e-5), (loss, ref)

    # Case 2: ragged K (not a multiple of 128) + partial last row tile.
    N2, K2 = 24, 200
    pos2 = jax.random.normal(k_pos2, (N2, 1), dtype=jnp.float32)
    neg2 = jax.random.normal(k_neg2, (N2, K2), dtype=jnp.float32)
    loss2 = jax.block_until_ready(contrastive_weight_head_loss(pos2, neg2))
    ref2 = jax.block_until_ready(_reference_loss(pos2, neg2))
    assert jnp.allclose(loss2, ref2, rtol=1e-5, atol=1e-5), (loss2, ref2)

    # Case 3: force the K-tiled online-logsumexp fallback path (tiny tile budget).
    loss3 = jax.block_until_ready(
        contrastive_weight_head_loss(pos2, neg2, max_tile_elems=1024))
    assert jnp.allclose(loss3, ref2, rtol=1e-5, atol=1e-5), (loss3, ref2)

    print("KERNEL_OK")
</pallas_src>

<mosaic_0001>
module attributes {stable_mosaic.version = 11 : i64} {
  func.func @_contrastive_loss_kernel(%arg0: i32, %arg1: i32, %arg2: memref<8x1xf32, #tpu.memory_space<vmem>>, %arg3: memref<8x32xf32, #tpu.memory_space<vmem>>, %arg4: memref<1x1xf32, #tpu.memory_space<smem>>, %arg5: memref<8x1xf32, #tpu.memory_space<vmem>>, %arg6: memref<8x1xf32, #tpu.memory_space<vmem>>) attributes {dimension_semantics = [#tpu.dimension_semantics<parallel>, #tpu.dimension_semantics<arbitrary>], iteration_bounds = array<i64: 1, 1>, scalar_prefetch = 0 : i64, scratch_operands = 2 : i64, tpu.core_type = #tpu.core_type<tc>, window_params = [{transform_indices = @transform_0, window_bounds = array<i64: 8, 1>}, {transform_indices = @transform_1, window_bounds = array<i64: 8, 32>}, {transform_indices = @transform_2, window_bounds = array<i64: 1, 1>}]} {
    %c0_i32 = arith.constant 0 : i32
    %0 = arith.cmpi eq, %arg1, %c0_i32 : i32
    %1 = arith.extui %0 : i1 to i32
    %c0_i32_0 = arith.constant 0 : i32
    %2 = arith.cmpi ne, %1, %c0_i32_0 : i32
    scf.if %2 {
      %cst_17 = arith.constant 0xFF800000 : f32
      %35 = vector.broadcast %cst_17 : f32 to vector<8x1xf32>
      %c0_18 = arith.constant 0 : index
      %c0_19 = arith.constant 0 : index
      %36 = vector.load %arg5[%c0_18, %c0_19] : memref<8x1xf32, #tpu.memory_space<vmem>>, vector<8x1xf32>
      tpu.vector_store %arg5[%c0_18, %c0_19], %35 {strides = array<i32>} : memref<8x1xf32, #tpu.memory_space<vmem>>, vector<8x1xf32>,
      %cst_20 = arith.constant 0.000000e+00 : f32
      %37 = vector.broadcast %cst_20 : f32 to vector<8x1xf32>
      %c0_21 = arith.constant 0 : index
      %c0_22 = arith.constant 0 : index
      %38 = vector.load %arg6[%c0_21, %c0_22] : memref<8x1xf32, #tpu.memory_space<vmem>>, vector<8x1xf32>
      tpu.vector_store %arg6[%c0_21, %c0_22], %37 {strides = array<i32>} : memref<8x1xf32, #tpu.memory_space<vmem>>, vector<8x1xf32>,
    } else {
    }
    %3 = tpu.iota {dimensions = array<i32: 1>} : vector<8x32xi32>
    %c32_i32 = arith.constant 32 : i32
    %4 = arith.muli %arg1, %c32_i32 : i32
    %5 = vector.broadcast %4 : i32 to vector<8x32xi32>
    %6 = arith.addi %3, %5 : vector<8x32xi32>
    %c32_i32_1 = arith.constant 32 : i32
    %7 = vector.broadcast %c32_i32_1 : i32 to vector<8x32xi32>
    %8 = arith.cmpi slt, %6, %7 : vector<8x32xi32>
    %c0 = arith.constant 0 : index
    %c0_2 = arith.constant 0 : index
    %9 = vector.load %arg3[%c0, %c0_2] : memref<8x32xf32, #tpu.memory_space<vmem>>, vector<8x32xf32>
    %cst = arith.constant -1.000000e+30 : f32
    %10 = vector.broadcast %cst : f32 to vector<8x32xf32>
    %11 = arith.select %8, %9, %10 : vector<8x32xi1>, vector<8x32xf32>
    %c0_3 = arith.constant 0 : index
    %c0_4 = arith.constant 0 : index
    %12 = vector.load %arg5[%c0_3, %c0_4] : memref<8x1xf32, #tpu.memory_space<vmem>>, vector<8x1xf32>
    %cst_5 = arith.constant dense<0xFF800000> : vector<8xf32>
    %13 = vector.multi_reduction <maximumf>, %11, %cst_5 [1] : vector<8x32xf32> to vector<8xf32>
    %14 = vector.shape_cast %13 : vector<8xf32> to vector<8x1xf32>
    %15 = arith.maximumf %12, %14 : vector<8x1xf32>
    %16 = arith.subf %12, %15 : vector<8x1xf32>
    %cst_6 = arith.constant 1.000000e+01 : f32
    %17 = vector.broadcast %cst_6 : f32 to vector<8x1xf32>
    %18 = arith.mulf %16, %17 : vector<8x1xf32>
    %19 = math.exp %18 : vector<8x1xf32>
    %c0_7 = arith.constant 0 : index
    %c0_8 = arith.constant 0 : index
    %20 = vector.load %arg6[%c0_7, %c0_8] : memref<8x1xf32, #tpu.memory_space<vmem>>, vector<8x1xf32>
    %21 = arith.mulf %19, %20 : vector<8x1xf32>
    %22 = vector.broadcast %15 : vector<8x1xf32> to vector<8x32xf32>
    %23 = arith.subf %11, %22 : vector<8x32xf32>
    %cst_9 = arith.constant 1.000000e+01 : f32
    %24 = vector.broadcast %cst_9 : f32 to vector<8x32xf32>
    %25 = arith.mulf %23, %24 : vector<8x32xf32>
    %26 = math.exp %25 : vector<8x32xf32>
    %cst_10 = arith.constant dense<0.000000e+00> : vector<8xf32>
    %27 = vector.multi_reduction <add>, %26, %cst_10 [1] : vector<8x32xf32> to vector<8xf32>
    %28 = vector.shape_cast %27 : vector<8xf32> to vector<8x1xf32>
    %29 = arith.addf %21, %28 : vector<8x1xf32>
    %c0_11 = arith.constant 0 : index
    %c0_12 = arith.constant 0 : index
    %30 = vector.load %arg6[%c0_11, %c0_12] : memref<8x1xf32, #tpu.memory_space<vmem>>, vector<8x1xf32>
    tpu.vector_store %arg6[%c0_11, %c0_12], %29 {strides = array<i32>} : memref<8x1xf32, #tpu.memory_space<vmem>>, vector<8x1xf32>,
    %c0_13 = arith.constant 0 : index
    %c0_14 = arith.constant 0 : index
    %31 = vector.load %arg5[%c0_13, %c0_14] : memref<8x1xf32, #tpu.memory_space<vmem>>, vector<8x1xf32>
    tpu.vector_store %arg5[%c0_13, %c0_14], %15 {strides = array<i32>} : memref<8x1xf32, #tpu.memory_space<vmem>>, vector<8x1xf32>,
    %c0_i32_15 = arith.constant 0 : i32
    %32 = arith.cmpi eq, %arg1, %c0_i32_15 : i32
    %33 = arith.extui %32 : i1 to i32
    %c0_i32_16 = arith.constant 0 : i32
    %34 = arith.cmpi ne, %33, %c0_i32_16 : i32
    scf.if %34 {
      %c0_17 = arith.constant 0 : index
      %c0_18 = arith.constant 0 : index
      %35 = vector.load %arg2[%c0_17, %c0_18] : memref<8x1xf32, #tpu.memory_space<vmem>>, vector<8x1xf32>
      %cst_19 = arith.constant 2.000000e+01 : f32
      %36 = vector.broadcast %cst_19 : f32 to vector<8x1xf32>
      %37 = arith.mulf %35, %36 : vector<8x1xf32>
      %c0_20 = arith.constant 0 : index
      %c0_21 = arith.constant 0 : index
      %38 = vector.load %arg5[%c0_20, %c0_21] : memref<8x1xf32, #tpu.memory_space<vmem>>, vector<8x1xf32>
      %cst_22 = arith.constant 1.000000e+01 : f32
      %39 = vector.broadcast %cst_22 : f32 to vector<8x1xf32>
      %40 = arith.mulf %38, %39 : vector<8x1xf32>
      %41 = arith.maximumf %37, %40 : vector<8x1xf32>
      %42 = arith.subf %37, %41 : vector<8x1xf32>
      %43 = math.exp %42 : vector<8x1xf32>
      %c0_23 = arith.constant 0 : index
      %c0_24 = arith.constant 0 : index
      %44 = vector.load %arg6[%c0_23, %c0_24] : memref<8x1xf32, #tpu.memory_space<vmem>>, vector<8x1xf32>
      %45 = arith.subf %40, %41 : vector<8x1xf32>
      %46 = math.exp %45 : vector<8x1xf32>
      %47 = arith.mulf %44, %46 : vector<8x1xf32>
      %48 = arith.addf %43, %47 : vector<8x1xf32>
      %49 = math.log %48 : vector<8x1xf32>
      %50 = arith.addf %41, %49 : vector<8x1xf32>
      %51 = arith.subf %50, %37 : vector<8x1xf32>
      %52 = tpu.iota {dimensions = array<i32: 0>} : vector<8x1xi32>
      %c8_i32 = arith.constant 8 : i32
      %53 = arith.muli %arg0, %c8_i32 : i32
      %54 = vector.broadcast %53 : i32 to vector<8x1xi32>
      %55 = arith.addi %52, %54 : vector<8x1xi32>
      %c8_i32_25 = arith.constant 8 : i32
      %56 = vector.broadcast %c8_i32_25 : i32 to vector<8x1xi32>
      %57 = arith.cmpi slt, %55, %56 : vector<8x1xi32>
      %cst_26 = arith.constant 0.000000e+00 : f32
      %58 = vector.broadcast %cst_26 : f32 to vector<8x1xf32>
      %59 = arith.select %57, %51, %58 : vector<8x1xi1>, vector<8x1xf32>
      %60 = vector.shape_cast %59 : vector<8x1xf32> to vector<1x8x1xf32>
      %cst_27 = arith.constant dense<0.000000e+00> : vector<1xf32>
      %61 = vector.multi_reduction <add>, %60, %cst_27 [1, 2] : vector<1x8x1xf32> to vector<1xf32>
      %62 = vector.shape_cast %61 : vector<1xf32> to vector<1x1x1xf32>
      %63 = vector.extract %62[0, 0, 0] : f32 from vector<1x1x1xf32>
      %c0_28 = arith.constant 0 : index
      %c0_29 = arith.constant 0 : index
      %64 = memref.load %arg4[%c0_28, %c0_29] : memref<1x1xf32, #tpu.memory_space<smem>>
      memref.store %63, %arg4[%c0_28, %c0_29] : memref<1x1xf32, #tpu.memory_space<smem>>
    } else {
    }
    return
  }
  func.func @transform_0(%arg0: i32, %arg1: i32) -> (i32, i32) {
    %c0_i32 = arith.constant 0 : i32
    %c0_i32_0 = arith.constant 0 : i32
    return %arg0, %c0_i32 : i32, i32
  }
  func.func @transform_1(%arg0: i32, %arg1: i32) -> (i32, i32) {
    %c0_i32 = arith.constant 0 : i32
    return %arg0, %arg1 : i32, i32
  }
  func.func @transform_2(%arg0: i32, %arg1: i32) -> (i32, i32) {
    %c0_i32 = arith.constant 0 : i32
    %c0_i32_0 = arith.constant 0 : i32
    return %arg0, %c0_i32 : i32, i32
  }
}

</mosaic_0001>

<bundles_post_ra>
// kernel: tpu_custom_call.1
= control target key start
LH: loop header
LB: loop body
LE: loop exit
PB: predicated region body
PF: predicated region fallthrough
CT: control target
= control target key end

     0   :  { %v19_v0 = vlaneseq  ;;  %s176_s0 = inlined_call_operand.vmem [shape: f32[8,1], index: 0, kind: input, shape index: {}]   ;;  %s177_s1 = inlined_call_operand.vmem [shape: f32[8,32], index: 1, kind: input, shape index: {}]   ;;  %s178_s2 = inlined_call_operand.hbm [shape: f32[1,1], index: 2, kind: output, shape index: {}]  }
   0x1   :  { %7 = vsyncpa [#allocation5], 0  ;;  %v25_v2 = vld [vmem:[%s177_s1] sm:$0xff]  ;;  %vm28_vm0 = vcmask 261120   ;;  %vm16_vm2 = vcmask 7168   ;;  %v141_v5 = vmov -inf  }
   0x2   :  { %v20_v1 = vand.u32 127, %v19_v0  ;;  %17 = vst.msk [vmem:[#allocation2] sm:$0xff] %vm16_vm2, %v141_v5  ;;  %v142_v6 = vmov 0   ;;  %v143_v7 = vmov 0.0   ;;  %v58_v19 = vld [vmem:[%s176_s0] sm:$0xff]  ;;  %s100_s13 = sshll.u32 %s178_s2, 4  ;;  %s101_s13 = int_to_ptr.hbm [resolvable:$true] %s100_s13 }
   0x3   :  { %116 = vset.pattern.permute.xlu0 %v142_v6  ;;  %18 = vst.msk [vmem:[#allocation3] sm:$0xff] %vm16_vm2, %v143_v7  ;;  %v59_v22 = vmul.f32 20.0, %v58_v19  ;;  %s144_s15 = smov [#allocation4]  }
   0x4   :  { %vm24_vm1 = vcmp.lt.s32.totalorder %v20_v1, 32 }
   0x5   :  { %v26_v3 = vsel %vm24_vm1, %v25_v2, -1e+30 }
   0x6   :  { %v29_v4 = vsel %vm28_vm0, %v26_v3, -inf }
   0x7   :  { %30 = vmax.xlane.f32.xlu0 %v29_v4 }
   0x9   :  { %v27_v8 = vld [vmem:[#allocation2] sm:$0xff] }
   0xa   :  { %v37_v26 = vld [vmem:[#allocation3] sm:$0xff] }
  0x7a   :  { %v31_v9 = vpop.xlane.xlu0 %30 }
  0x7b   :  { %v32_v10 = vmax.f32 %v27_v8, %v31_v9 }
  0x7d   :  { %v33_v11 = vsub.f32 %v27_v8, %v32_v10  ;;  %54 = vst.msk [vmem:[#allocation2] sm:$0xff] %vm16_vm2, %v32_v10  ;;  %41 = vperm.xlu0 %116, %v32_v10  }
  0x7f   :  { %v34_v18 = vmul.f32 10.0, %v33_v11 }
  0x81   :  { %v35_v21 = vmul.f32 1.442695, %v34_v18 }
  0x84   :  { %v60_v20 = vld [vmem:[#allocation2] sm:$0xff] }
  0x85   :  { %v61_v23 = vmul.f32 10.0, %v60_v20 }
  0x87   :  { %v62_v24 = vmax.f32 %v59_v22, %v61_v23 }
  0x89   :  { %v67_v27 = vsub.f32 %v61_v23, %v62_v24  ;;  %v63_v28 = vsub.f32 %v59_v22, %v62_v24 }
  0x8b   :  { %v68_v31 = vmul.f32 1.442695, %v67_v27  ;;  %v64_v33 = vmul.f32 1.442695, %v63_v28 }
  0xef   :  { %v42_v12 = vpop.permute.xlu0 %41 }
  0xf0   :  { %v44_v13 = vsub.f32 %v26_v3, %v42_v12 }
  0xf2   :  { %v45_v14 = vmul.f32 10.0, %v44_v13 }
  0xf4   :  { %v46_v15 = vmul.f32 1.442695, %v45_v14 }
  0xf6   :  { %117 = vpow2.f32 %v46_v15 }
  0xf7   :  { %119 = vpow2.f32 %v35_v21 }
  0xf8   :  { %121 = vpow2.f32 %v68_v31 }
  0xf9   :  { %123 = vpow2.f32 %v64_v33 }
  0xfc   :  { %v118_v16 = vpop.eup %117 }
  0xfd   :  { %v48_v17 = vsel %vm28_vm0, %v118_v16, 0.0  ;;  %v120_v25 = vpop.eup %119 }
  0xfe   :  { %49 = vadd.xlane.f32.xlu1 %v48_v17  ;;  %v38_v29 = vmul.f32 %v120_v25, %v37_v26  ;;  %v122_v34 = vpop.eup %121 }
  0xff   :  { %v124_v37 = vpop.eup %123 }
 0x171   :  { %v50_v30 = vpop.xlane.xlu1 %49 }
 0x172   :  { %v51_v32 = vadd.f32 %v50_v30, %v38_v29 }
 0x174   :  { %53 = vst.msk [vmem:[#allocation3] sm:$0xff] %vm16_vm2, %v51_v32 }
 0x17b   :  { %v66_v35 = vld [vmem:[#allocation3] sm:$0xff] }
 0x17c   :  { %v70_v36 = vmul.f32 %v122_v34, %v66_v35 }
 0x17e   :  { %v71_v38 = vadd.f32 %v124_v37, %v70_v36 }
 0x180   :  { %125 = vlog2.f32 %v71_v38 }
 0x186   :  { %v126_v39 = vpop.eup %125 }
 0x187   :  { %v73_v40 = vmul.f32 0.6931472, %v126_v39 }
 0x189   :  { %v74_v41 = vadd.f32 %v73_v40, %v62_v24 }
 0x18b   :  { %v75_v42 = vsub.f32 %v74_v41, %v59_v22 }
 0x18d   :  { %v83_v43 = vsel %vm16_vm2, %v75_v42, 0.0 }
 0x18e   :  { %84 = vadd.xlane.f32.xlu1 %v83_v43 }
 0x201   :  { %v85_v44 = vpop.xlane.xlu1 %84 }
 0x202   :  { %v86_v45 = vrot.slane %v85_v44, 4 }
 0x204   :  { %v87_v46 = vadd.f32 %v86_v45, %v85_v44 }
 0x206   :  { %v88_v47 = vrot.slane %v87_v46, 2 }
 0x208   :  { %v89_v48 = vadd.f32 %v88_v47, %v87_v46 }
 0x20a   :  { %v90_v49 = vrot.slane %v89_v48, 1 }
 0x20c   :  { %v91_v50 = vadd.f32 %v90_v49, %v89_v48 }
 0x20e   :  { %110 = vpush %v91_v50 }
 0x23f   :  { %s111_s14 = spop %110 }
 0x240   :  { %94 = sst [smem:[#allocation4]] %s111_s14 }
 0x241   :  { %103 = dma.smem_to_hbm %s144_s15, 16, %s101_s13, [#allocation5]  }
 0x242   :  { %139 = dma.done.wait [#allocation5], 16  }
 0x243   :  { %140 = vsyncadd [#allocation5], 4294967280 }
 0x244   :  { %108 = sfence }
 0x245   :  { %109 = vsyncpa [#allocation5], 1 }

</bundles_post_ra>
